<compile_context>
chip_gen: v5e
topology: v5e:2x2
jax: 0.10.0
libtpu: 0.0.40
codegen_flags: <defaults>
</compile_context>

<pallas_src>
import jax
import jax.numpy as jnp
from jax import lax
from jax.experimental import pallas as pl
from jax.experimental.pallas import tpu as pltpu


# --------------------------------------------------------------------------
# Kernels
# --------------------------------------------------------------------------
def _fused_small_kernel(a_ref, x_ref, w_ref, o_ref):
    """Single-step path: whole problem resident in VMEM."""
    # XW = X @ W^T without an explicit transpose (contract the last axes).
    xw = lax.dot_general(
        x_ref[...], w_ref[...],
        dimension_numbers=(((1,), (1,)), ((), ())),
        preferred_element_type=jnp.float32,
    )
    out = jnp.dot(a_ref[...], xw.astype(a_ref.dtype),
                  preferred_element_type=jnp.float32)
    o_ref[...] = jnp.tanh(out).astype(o_ref.dtype)


def _linear_kernel(x_ref, w_ref, o_ref):
    """One row tile of XW = X @ W^T (nn.Linear with bias=False)."""
    o_ref[...] = lax.dot_general(
        x_ref[...], w_ref[...],
        dimension_numbers=(((1,), (1,)), ((), ())),
        preferred_element_type=jnp.float32,
    ).astype(o_ref.dtype)


def _agg_kernel(a_ref, xw_ref, o_ref, acc_ref):
    """K-tiled tanh(A_hat @ XW): accumulate in f32, finalize on last K step."""
    k = pl.program_id(1)

    @pl.when(k == 0)
    def _():
        acc_ref[...] = jnp.zeros_like(acc_ref)

    acc_ref[...] += jnp.dot(a_ref[...], xw_ref[...],
                            preferred_element_type=jnp.float32)

    @pl.when(k == pl.num_programs(1) - 1)
    def _():
        o_ref[...] = jnp.tanh(acc_ref[...]).astype(o_ref.dtype)


# --------------------------------------------------------------------------
# Wrappers
# --------------------------------------------------------------------------
def _divisor_tile(n, target, align):
    """Largest t <= target with n % t == 0 and t % align == 0.

    Falls back to the full extent n (always a legal block shape)."""
    t = min(target, n)
    t -= t % align
    while t >= align:
        if n % t == 0:
            return t
        t -= align
    return n


def _linear_no_bias(x, w, *, row_tile=1024, out_dtype=jnp.float32):
    """XW = X @ W^T, computed once, tiled over rows of X."""
    n, din = x.shape
    dout = w.shape[0]
    tn = _divisor_tile(n, row_tile, 8)
    return pl.pallas_call(
        _linear_kernel,
        out_shape=jax.ShapeDtypeStruct((n, dout), out_dtype),
        grid_spec=pltpu.PrefetchScalarGridSpec(
            num_scalar_prefetch=0,
            grid=(n // tn,),
            in_specs=[
                pl.BlockSpec((tn, din), lambda i: (i, 0)),
                # W is tiny and constant-index: stays resident across steps.
                pl.BlockSpec((dout, din), lambda i: (0, 0)),
            ],
            out_specs=pl.BlockSpec((tn, dout), lambda i: (i, 0)),
        ),
        compiler_params=pltpu.CompilerParams(
            dimension_semantics=("parallel",)),
    )(x, w)


def graph_conv(a_hat, x, w, *, tm=256, tk=512, matmul_dtype=None,
               small_path_bytes=4 * 1024 * 1024):
    """out = tanh(A_hat @ (x @ w.T))  -- GraphConv forward as Pallas TPU kernels.

    matmul_dtype: optional dtype (e.g. jnp.bfloat16) used for A_hat and the XW
        intermediate in the bandwidth-bound aggregation matmul; accumulation
        and the output stay float32.
    """
    n, din = x.shape
    dout, din_w = w.shape
    assert din == din_w, "weight/input feature mismatch"
    assert a_hat.shape == (n, n), "A_hat must be [N, N]"

    a_dtype = jnp.dtype(matmul_dtype) if matmul_dtype is not None else jnp.dtype(jnp.float32)
    a = a_hat.astype(a_dtype)

    # Total working set if everything were resident in VMEM at once.
    working_set = (n * n * a_dtype.itemsize          # A_hat
                   + (n * din + dout * din) * 4      # X, W
                   + n * dout * 4)                   # output
    if working_set <= small_path_bytes:
        # ---- small path: one fused kernel, single grid step ---------------
        return pl.pallas_call(
            _fused_small_kernel,
            out_shape=jax.ShapeDtypeStruct((n, dout), jnp.float32),
            grid_spec=pltpu.PrefetchScalarGridSpec(
                num_scalar_prefetch=0,
                grid=(1,),
                in_specs=[
                    pl.BlockSpec((n, n), lambda i: (0, 0)),
                    pl.BlockSpec((n, din), lambda i: (0, 0)),
                    pl.BlockSpec((dout, din), lambda i: (0, 0)),
                ],
                out_specs=pl.BlockSpec((n, dout), lambda i: (0, 0)),
            ),
            compiler_params=pltpu.CompilerParams(
                dimension_semantics=("arbitrary",)),
        )(a, x, w)

    # ---- large path ------------------------------------------------------
    # 1) XW = X @ W^T, hoisted out of the per-row-tile hot path (done once).
    xw = _linear_no_bias(x, w, out_dtype=a_dtype)

    # 2) tanh(A_hat @ XW) as a K-tiled reduction with an f32 accumulator.
    tm_ = _divisor_tile(n, tm, 8)     # row tile (sublane-aligned)
    tk_ = _divisor_tile(n, tk, 128)   # K tile   (lane-aligned)
    return pl.pallas_call(
        _agg_kernel,
        out_shape=jax.ShapeDtypeStruct((n, dout), jnp.float32),
        grid_spec=pltpu.PrefetchScalarGridSpec(
            num_scalar_prefetch=0,
            grid=(n // tm_, n // tk_),
            in_specs=[
                pl.BlockSpec((tm_, tk_), lambda i, k: (i, k)),
                pl.BlockSpec((tk_, dout), lambda i, k: (k, 0)),
            ],
            out_specs=pl.BlockSpec((tm_, dout), lambda i, k: (i, 0)),
            scratch_shapes=[pltpu.VMEM((tm_, dout), jnp.float32)],
        ),
        compiler_params=pltpu.CompilerParams(
            dimension_semantics=("parallel", "arbitrary")),
    )(a, xw)


def _reference(a_hat, x, w):
    return jnp.tanh(a_hat @ (x @ w.T))


if __name__ == "__main__":
    key = jax.random.PRNGKey(0)
    k_a, k_x, k_w, k_a2, k_x2 = jax.random.split(key, 5)

    # Shapes consistent with the module: N nodes, input_dim -> output_dim.
    N, INPUT_DIM, OUTPUT_DIM = 256, 64, 128

    x = jax.random.normal(k_x, (N, INPUT_DIM), dtype=jnp.float32)

    # Row-normalized random adjacency (A_hat), deterministic.
    a_raw = jax.random.uniform(k_a, (N, N), dtype=jnp.float32)
    a_hat = a_raw / jnp.sum(a_raw, axis=-1, keepdims=True)

    # nn.Linear(input_dim, output_dim, bias=False): weight [output_dim, input_dim];
    # init_weight(..., 'tanh') ~ Xavier-uniform with tanh gain (5/3).
    gain = 5.0 / 3.0
    limit = gain * jnp.sqrt(6.0 / (INPUT_DIM + OUTPUT_DIM))
    w = jax.random.uniform(k_w, (OUTPUT_DIM, INPUT_DIM), dtype=jnp.float32,
                           minval=-limit, maxval=limit)

    # 1) Small fused path (single grid step), f32.
    out = jax.block_until_ready(graph_conv(a_hat, x, w))
    ref = _reference(a_hat, x, w)
    assert out.shape == (N, OUTPUT_DIM)
    assert jnp.allclose(out, ref, atol=1e-5, rtol=1e-5), "small-path mismatch"

    # 2) Tiled path (XW hoisted once + K-tiled A@XW reduction), f32, larger N.
    N2 = 1024
    x2 = jax.random.normal(k_x2, (N2, INPUT_DIM), dtype=jnp.float32)
    a2_raw = jax.random.uniform(k_a2, (N2, N2), dtype=jnp.float32)
    a2 = a2_raw / jnp.sum(a2_raw, axis=-1, keepdims=True)
    out2 = jax.block_until_ready(graph_conv(a2, x2, w))
    ref2 = _reference(a2, x2, w)
    assert jnp.allclose(out2, ref2, atol=1e-4, rtol=1e-4), "tiled-path mismatch"

    # 3) bf16 A_hat / XW for the bandwidth-bound aggregation (f32 accumulate);
    #    force the tiled path to exercise it end-to-end.
    out_bf16 = jax.block_until_ready(
        graph_conv(a2, x2, w, matmul_dtype=jnp.bfloat16, small_path_bytes=0))
    assert jnp.allclose(out_bf16, ref2, atol=3e-2, rtol=3e-2), "bf16-path mismatch"

    print("KERNEL_OK")
</pallas_src>

<mosaic_0001>
module attributes {stable_mosaic.version = 11 : i64} {
  func.func @_fused_small_kernel(%arg0: i32, %arg1: memref<256x256xf32, #tpu.memory_space<vmem>>, %arg2: memref<256x64xf32, #tpu.memory_space<vmem>>, %arg3: memref<128x64xf32, #tpu.memory_space<vmem>>, %arg4: memref<256x128xf32, #tpu.memory_space<vmem>>) attributes {dimension_semantics = [#tpu.dimension_semantics<arbitrary>], iteration_bounds = array<i64: 1>, scalar_prefetch = 0 : i64, scratch_operands = 0 : i64, tpu.core_type = #tpu.core_type<tc>, window_params = [{pipeline_mode = #tpu.pipeline_mode<synchronous>, transform_indices = @transform_0, window_bounds = array<i64: 256, 256>}, {pipeline_mode = #tpu.pipeline_mode<synchronous>, transform_indices = @transform_1, window_bounds = array<i64: 256, 64>}, {pipeline_mode = #tpu.pipeline_mode<synchronous>, transform_indices = @transform_2, window_bounds = array<i64: 128, 64>}, {pipeline_mode = #tpu.pipeline_mode<synchronous>, transform_indices = @transform_3, window_bounds = array<i64: 256, 128>}]} {
    %c0 = arith.constant 0 : index
    %c0_0 = arith.constant 0 : index
    %0 = vector.load %arg2[%c0, %c0_0] : memref<256x64xf32, #tpu.memory_space<vmem>>, vector<256x64xf32>
    %c0_1 = arith.constant 0 : index
    %c0_2 = arith.constant 0 : index
    %1 = vector.load %arg3[%c0_1, %c0_2] : memref<128x64xf32, #tpu.memory_space<vmem>>, vector<128x64xf32>
    %cst = arith.constant dense<0.000000e+00> : vector<256x128xf32>
    %2 = tpu.matmul %0, %1, %cst {dimension_numbers = #tpu.dot_dimension_numbers<[1], [1], [0], [0], [0, 0, 1, 0], [], []>} : vector<256x64xf32>, vector<128x64xf32>, vector<256x128xf32> -> vector<256x128xf32>
    %c0_3 = arith.constant 0 : index
    %c0_4 = arith.constant 0 : index
    %3 = vector.load %arg1[%c0_3, %c0_4] : memref<256x256xf32, #tpu.memory_space<vmem>>, vector<256x256xf32>
    %cst_5 = arith.constant dense<0.000000e+00> : vector<256x128xf32>
    %4 = tpu.matmul %3, %2, %cst_5 {dimension_numbers = #tpu.dot_dimension_numbers<[1], [0], [0], [1], [0, 0, 1, 1], [], []>} : vector<256x256xf32>, vector<256x128xf32>, vector<256x128xf32> -> vector<256x128xf32>
    %5 = math.tanh %4 : vector<256x128xf32>
    %c0_6 = arith.constant 0 : index
    %c0_7 = arith.constant 0 : index
    %6 = vector.load %arg4[%c0_6, %c0_7] : memref<256x128xf32, #tpu.memory_space<vmem>>, vector<256x128xf32>
    tpu.vector_store %arg4[%c0_6, %c0_7], %5 {strides = array<i32>} : memref<256x128xf32, #tpu.memory_space<vmem>>, vector<256x128xf32>,
    return
  }
  func.func @transform_0(%arg0: i32) -> (i32, i32) {
    %c0_i32 = arith.constant 0 : i32
    %c0_i32_0 = arith.constant 0 : i32
    %c0_i32_1 = arith.constant 0 : i32
    return %c0_i32, %c0_i32_0 : i32, i32
  }
  func.func @transform_1(%arg0: i32) -> (i32, i32) {
    %c0_i32 = arith.constant 0 : i32
    %c0_i32_0 = arith.constant 0 : i32
    %c0_i32_1 = arith.constant 0 : i32
    return %c0_i32, %c0_i32_0 : i32, i32
  }
  func.func @transform_2(%arg0: i32) -> (i32, i32) {
    %c0_i32 = arith.constant 0 : i32
    %c0_i32_0 = arith.constant 0 : i32
    %c0_i32_1 = arith.constant 0 : i32
    return %c0_i32, %c0_i32_0 : i32, i32
  }
  func.func @transform_3(%arg0: i32) -> (i32, i32) {
    %c0_i32 = arith.constant 0 : i32
    %c0_i32_0 = arith.constant 0 : i32
    %c0_i32_1 = arith.constant 0 : i32
    return %c0_i32, %c0_i32_0 : i32, i32
  }
}

</mosaic_0001>

<bundles_post_ra>
// kernel: tpu_custom_call.1
= control target key start
LH: loop header
LB: loop body
LE: loop exit
PB: predicated region body
PF: predicated region fallthrough
CT: control target
= control target key end

     0   :  { %8 = vsyncpa [#allocation3], 0  ;;  %s1212_s0 = inlined_call_operand.hbm [shape: f32[256,256], index: 0, kind: input, shape index: {}]   ;;  %s1213_s1 = inlined_call_operand.vmem [shape: f32[256,64], index: 1, kind: input, shape index: {}]   ;;  %s1214_s2 = inlined_call_operand.vmem [shape: f32[128,64], index: 2, kind: input, shape index: {}]   ;;  %s1215_s3 = inlined_call_operand.hbm [shape: f32[256,128], index: 3, kind: output, shape index: {}]  }
   0x1   :  { %9 = vsyncpa [#allocation4], 0  ;;  %s14_s14 = sshll.u32 %s1212_s0, 4  ;;  %s928_s15 = smov [#allocation2]   ;;  %s15_s14 = int_to_ptr.hbm [resolvable:$true] %s14_s14 }
   0x2   :  { %s16_s16 = sshll.u32 %s928_s15, 4  ;;  %s929_s17 = smov 256   ;;  %s17_s16 = int_to_ptr.vmem [resolvable:$true] %s16_s16 }
   0x3   :  { %s930_s18 = smov 16  }
   0x4   :  { %22 = dma.hbm_to_vmem [thread:$0]  %s15_s14, 8192, %s17_s16, [#allocation3], %s929_s17, %s929_s17, %s930_s18  }
   0x5   :  { %924 = dma.done.wait [#allocation3], 8192  }
   0x6   :  { %925 = vsyncadd [#allocation3], 4294959104  ;;  %vm79_vm0 = vcmask 523264   ;;  %v78_v0 = vld [vmem:[%s1214_s2 + $0x78] sm:$0xff]  ;;  %v77_v1 = vld [vmem:[%s1214_s2 + $0x70] sm:$0xff]  ;;  %s697_s30 = sshll.u32 %s1215_s3, 4  ;;  %s698_s30 = int_to_ptr.hbm [resolvable:$true] %s697_s30 }
   0x7   :  { %710 = vmatpush.xpose.msk.msra.mxu0 %vm79_vm0, %v78_v0  ;;  %758 = vmatpush.xpose.msk.msra.mxu3 %vm79_vm0, %v78_v0  ;;  %v76_v2 = vld [vmem:[%s1214_s2 + $0x68] sm:$0xff]  ;;  %v75_v3 = vld [vmem:[%s1214_s2 + $0x60] sm:$0xff]  ;;  %v74_v4 = vld [vmem:[%s1214_s2 + $0x58] sm:$0xff]  ;;  %s932_s4 = smov 128   ;;  %s933_s5 = smov 8  }
   0x8   :  { %v73_v5 = vld [vmem:[%s1214_s2 + $0x50] sm:$0xff]  ;;  %v72_v6 = vld [vmem:[%s1214_s2 + $0x48] sm:$0xff]  ;;  %v71_v7 = vld [vmem:[%s1214_s2 + $0x40] sm:$0xff] }
   0x9   :  { %v70_v8 = vld [vmem:[%s1214_s2 + $0x38] sm:$0xff]  ;;  %v69_v9 = vld [vmem:[%s1214_s2 + $0x30] sm:$0xff]  ;;  %v68_v10 = vld [vmem:[%s1214_s2 + $0x28] sm:$0xff] }
   0xa   :  { %v67_v11 = vld [vmem:[%s1214_s2 + $0x20] sm:$0xff]  ;;  %v66_v12 = vld [vmem:[%s1214_s2 + $0x18] sm:$0xff]  ;;  %v65_v13 = vld [vmem:[%s1214_s2 + $0x10] sm:$0xff] }
   0xb   :  { %711 = vmatpush.xpose.msk.msra.mxu0 %vm79_vm0, %v77_v1  ;;  %759 = vmatpush.xpose.msk.msra.mxu3 %vm79_vm0, %v77_v1  ;;  %v64_v14 = vld [vmem:[%s1214_s2 + $0x8] sm:$0xff]  ;;  %v63_v15 = vld [vmem:[%s1214_s2] sm:$0xff]  ;;  %v53_v17 = vld [vmem:[%s1213_s1 + $0xb0] sm:$0xff] }
   0xc   :  { %v31_v16 = vld [vmem:[%s1213_s1] sm:$0xff]  ;;  %v32_v18 = vld [vmem:[%s1213_s1 + $0x8] sm:$0xff]  ;;  %v54_v19 = vld [vmem:[%s1213_s1 + $0xb8] sm:$0xff] }
   0xd   :  { %v33_v20 = vld [vmem:[%s1213_s1 + $0x10] sm:$0xff]  ;;  %v55_v21 = vld [vmem:[%s1213_s1 + $0xc0] sm:$0xff]  ;;  %v34_v22 = vld [vmem:[%s1213_s1 + $0x18] sm:$0xff] }
   0xe   :  { %v56_v23 = vld [vmem:[%s1213_s1 + $0xc8] sm:$0xff]  ;;  %v35_v24 = vld [vmem:[%s1213_s1 + $0x20] sm:$0xff]  ;;  %v57_v25 = vld [vmem:[%s1213_s1 + $0xd0] sm:$0xff] }
   0xf   :  { %712 = vmatpush.xpose.msk.msra.mxu0 %vm79_vm0, %v76_v2  ;;  %760 = vmatpush.xpose.msk.msra.mxu3 %vm79_vm0, %v76_v2  ;;  %v36_v26 = vld [vmem:[%s1213_s1 + $0x28] sm:$0xff]  ;;  %v58_v27 = vld [vmem:[%s1213_s1 + $0xd8] sm:$0xff]  ;;  %v37_v28 = vld [vmem:[%s1213_s1 + $0x30] sm:$0xff] }
  0x10   :  { %v59_v29 = vld [vmem:[%s1213_s1 + $0xe0] sm:$0xff]  ;;  %v38_v30 = vld [vmem:[%s1213_s1 + $0x38] sm:$0xff]  ;;  %v60_v31 = vld [vmem:[%s1213_s1 + $0xe8] sm:$0xff] }
  0x11   :  { %v39_v32 = vld [vmem:[%s1213_s1 + $0x40] sm:$0xff]  ;;  %v61_v33 = vld [vmem:[%s1213_s1 + $0xf0] sm:$0xff]  ;;  %v40_v34 = vld [vmem:[%s1213_s1 + $0x48] sm:$0xff] }
  0x12   :  { %v62_v35 = vld [vmem:[%s1213_s1 + $0xf8] sm:$0xff]  ;;  %v41_v36 = vld [vmem:[%s1213_s1 + $0x50] sm:$0xff]  ;;  %v43_v38 = vld [vmem:[%s1213_s1 + $0x60] sm:$0xff] }
  0x13   :  { %713 = vmatpush.xpose.msk.msra.mxu0 %vm79_vm0, %v75_v3  ;;  %761 = vmatpush.xpose.msk.msra.mxu3 %vm79_vm0, %v75_v3  ;;  %v42_v37 = vld [vmem:[%s1213_s1 + $0x58] sm:$0xff]  ;;  %v44_v39 = vld [vmem:[%s1213_s1 + $0x68] sm:$0xff]  ;;  %v45_v40 = vld [vmem:[%s1213_s1 + $0x70] sm:$0xff] }
  0x14   :  { %v46_v41 = vld [vmem:[%s1213_s1 + $0x78] sm:$0xff]  ;;  %v47_v43 = vld [vmem:[%s1213_s1 + $0x80] sm:$0xff]  ;;  %v48_v46 = vld [vmem:[%s1213_s1 + $0x88] sm:$0xff] }
  0x15   :  { %v49_v49 = vld [vmem:[%s1213_s1 + $0x90] sm:$0xff]  ;;  %v50_v52 = vld [vmem:[%s1213_s1 + $0x98] sm:$0xff]  ;;  %v51_v55 = vld [vmem:[%s1213_s1 + $0xa0] sm:$0xff] }
  0x16   :  { %v52_v58 = vld [vmem:[%s1213_s1 + $0xa8] sm:$0xff]  ;;  %s931_s1 = smov [#allocation5]  }
  0x17   :  { %714 = vmatpush.xpose.msk.msra.mxu0 %vm79_vm0, %v74_v4  ;;  %762 = vmatpush.xpose.msk.msra.mxu3 %vm79_vm0, %v74_v4  ;;  %s695_s2 = sshll.u32 %s931_s1, 4  ;;  %s696_s2 = int_to_ptr.vmem [resolvable:$true] %s695_s2 }
  0x1b   :  { %715 = vmatpush.xpose.msk.msra.mxu0 %vm79_vm0, %v73_v5  ;;  %763 = vmatpush.xpose.msk.msra.mxu3 %vm79_vm0, %v73_v5 }
  0x1f   :  { %716 = vmatpush.xpose.msk.msra.mxu0 %vm79_vm0, %v72_v6  ;;  %764 = vmatpush.xpose.msk.msra.mxu3 %vm79_vm0, %v72_v6 }
  0x23   :  { %717 = vmatpush.xpose.msk.msra.mxu0 %vm79_vm0, %v71_v7  ;;  %765 = vmatpush.xpose.msk.msra.mxu3 %vm79_vm0, %v71_v7 }
  0x27   :  { %718 = vmatpush.xpose.msk.msra.mxu0 %vm79_vm0, %v70_v8  ;;  %766 = vmatpush.xpose.msk.msra.mxu3 %vm79_vm0, %v70_v8 }
  0x2b   :  { %719 = vmatpush.xpose.msk.msra.mxu0 %vm79_vm0, %v69_v9  ;;  %767 = vmatpush.xpose.msk.msra.mxu3 %vm79_vm0, %v69_v9 }
  0x2f   :  { %720 = vmatpush.xpose.msk.msra.mxu0 %vm79_vm0, %v68_v10  ;;  %768 = vmatpush.xpose.msk.msra.mxu3 %vm79_vm0, %v68_v10 }
  0x33   :  { %721 = vmatpush.xpose.msk.msra.mxu0 %vm79_vm0, %v67_v11  ;;  %769 = vmatpush.xpose.msk.msra.mxu3 %vm79_vm0, %v67_v11 }
  0x37   :  { %722 = vmatpush.xpose.msk.msra.mxu0 %vm79_vm0, %v66_v12  ;;  %770 = vmatpush.xpose.msk.msra.mxu3 %vm79_vm0, %v66_v12 }
  0x3b   :  { %723 = vmatpush.xpose.msk.msra.mxu0 %vm79_vm0, %v65_v13  ;;  %771 = vmatpush.xpose.msk.msra.mxu3 %vm79_vm0, %v65_v13  ;;  %v337_v13 = vld [vmem:[#allocation2] sm:$0xff] }
  0x3f   :  { %724 = vmatpush.xpose.msk.msra.mxu0 %vm79_vm0, %v64_v14  ;;  %772 = vmatpush.xpose.msk.msra.mxu3 %vm79_vm0, %v64_v14 }
  0x43   :  { %725 = vmatpush.xpose.msk.msra.mxu0 %vm79_vm0, %v63_v15  ;;  %773 = vmatpush.xpose.msk.msra.mxu3 %vm79_vm0, %v63_v15  ;;  %v339_v15 = vld [vmem:[#allocation2 + $0x10] sm:$0xff] }
  0x46   :  { %726 = vmatmul.msk.f32.vlgmr.msra.gmra.mxu0 %vm79_vm0, %v31_v16  ;;  %748 = vmatmul.msk.f32.vlgmr.msra.gmra.mxu3 %vm79_vm0, %v53_v17  ;;  %v341_v17 = vld [vmem:[#allocation2 + $0x20] sm:$0xff] }
  0x4e   :  { %727 = vmatmul.msk.f32.gmra.mxu0 %vm79_vm0, %v32_v18  ;;  %749 = vmatmul.msk.f32.gmra.mxu3 %vm79_vm0, %v54_v19  ;;  %v343_v19 = vld [vmem:[#allocation2 + $0x30] sm:$0xff] }
  0x56   :  { %728 = vmatmul.msk.f32.gmra.mxu0 %vm79_vm0, %v33_v20  ;;  %750 = vmatmul.msk.f32.gmra.mxu3 %vm79_vm0, %v55_v21  ;;  %v338_v20 = vld [vmem:[#allocation2 + $0x8] sm:$0xff]  ;;  %v345_v21 = vld [vmem:[#allocation2 + $0x40] sm:$0xff] }
  0x5e   :  { %729 = vmatmul.msk.f32.gmra.mxu0 %vm79_vm0, %v34_v22  ;;  %751 = vmatmul.msk.f32.gmra.mxu3 %vm79_vm0, %v56_v23  ;;  %v340_v22 = vld [vmem:[#allocation2 + $0x18] sm:$0xff]  ;;  %v347_v23 = vld [vmem:[#allocation2 + $0x50] sm:$0xff] }
  0x66   :  { %730 = vmatmul.msk.f32.gmra.mxu0 %vm79_vm0, %v35_v24  ;;  %752 = vmatmul.msk.f32.gmra.mxu3 %vm79_vm0, %v57_v25  ;;  %v342_v24 = vld [vmem:[#allocation2 + $0x28] sm:$0xff]  ;;  %v349_v25 = vld [vmem:[#allocation2 + $0x60] sm:$0xff] }
  0x6e   :  { %731 = vmatmul.msk.f32.gmra.mxu0 %vm79_vm0, %v36_v26  ;;  %753 = vmatmul.msk.f32.gmra.mxu3 %vm79_vm0, %v58_v27  ;;  %v344_v26 = vld [vmem:[#allocation2 + $0x38] sm:$0xff]  ;;  %v389_v27 = vld [vmem:[#allocation2 + $0x1a0] sm:$0xff] }
  0x76   :  { %732 = vmatmul.msk.f32.gmra.mxu0 %vm79_vm0, %v37_v28  ;;  %754 = vmatmul.msk.f32.gmra.mxu3 %vm79_vm0, %v59_v29  ;;  %v351_v28 = vld [vmem:[#allocation2 + $0x70] sm:$0xff]  ;;  %v346_v29 = vld [vmem:[#allocation2 + $0x48] sm:$0xff] }
  0x7e   :  { %733 = vmatmul.msk.f32.gmra.mxu0 %vm79_vm0, %v38_v30  ;;  %755 = vmatmul.msk.f32.gmra.mxu3 %vm79_vm0, %v60_v31  ;;  %v391_v30 = vld [vmem:[#allocation2 + $0x1b0] sm:$0xff]  ;;  %v353_v31 = vld [vmem:[#allocation2 + $0x80] sm:$0xff] }
  0x86   :  { %734 = vmatmul.msk.f32.gmra.mxu0 %vm79_vm0, %v39_v32  ;;  %756 = vmatmul.msk.f32.gmra.mxu3 %vm79_vm0, %v61_v33  ;;  %v348_v32 = vld [vmem:[#allocation2 + $0x58] sm:$0xff]  ;;  %v393_v33 = vld [vmem:[#allocation2 + $0x1c0] sm:$0xff] }
  0x8e   :  { %735 = vmatmul.msk.f32.gmra.mxu0 %vm79_vm0, %v40_v34  ;;  %757 = vmatmul.msk.f32.gmra.mxu3 %vm79_vm0, %v62_v35  ;;  %v355_v34 = vld [vmem:[#allocation2 + $0x90] sm:$0xff]  ;;  %v350_v35 = vld [vmem:[#allocation2 + $0x68] sm:$0xff] }
  0x96   :  { %736 = vmatmul.msk.f32.gmra.mxu0 %vm79_vm0, %v41_v36  ;;  %v395_v36 = vld [vmem:[#allocation2 + $0x1d0] sm:$0xff] }
  0x9e   :  { %737 = vmatmul.msk.f32.gmra.mxu0 %vm79_vm0, %v42_v37  ;;  %v357_v37 = vld [vmem:[#allocation2 + $0xa0] sm:$0xff] }
  0xa6   :  { %738 = vmatmul.msk.f32.gmra.mxu0 %vm79_vm0, %v43_v38  ;;  %v352_v38 = vld [vmem:[#allocation2 + $0x78] sm:$0xff] }
  0xae   :  { %739 = vmatmul.msk.f32.gmra.mxu0 %vm79_vm0, %v44_v39  ;;  %v397_v39 = vld [vmem:[#allocation2 + $0x1e0] sm:$0xff] }
  0xb6   :  { %740 = vmatmul.msk.f32.gmra.mxu0 %vm79_vm0, %v45_v40  ;;  %v359_v40 = vld [vmem:[#allocation2 + $0xb0] sm:$0xff] }
  0xbe   :  { %741 = vmatmul.msk.f32.gmra.mxu0 %vm79_vm0, %v46_v41  ;;  %v354_v41 = vld [vmem:[#allocation2 + $0x88] sm:$0xff] }
  0xc3   :  { %v1141_v42 = vpop.f32.mrf.mxu0 }
  0xc6   :  { %742 = vmatmul.msk.f32.gmra.mxu0 %vm79_vm0, %v47_v43  ;;  %v361_v43 = vld [vmem:[#allocation2 + $0xc0] sm:$0xff] }
  0xc9   :  { %v1147_v44 = vpop.f32.mrf.mxu3 }
  0xcb   :  { %v1149_v45 = vpop.f32.mrf.mxu0 }
  0xce   :  { %743 = vmatmul.msk.f32.gmra.mxu0 %vm79_vm0, %v48_v46  ;;  %v358_v46 = vld [vmem:[#allocation2 + $0xa8] sm:$0xff] }
  0xd1   :  { %v1155_v47 = vpop.f32.mrf.mxu3 }
  0xd3   :  { %v1157_v48 = vpop.f32.mrf.mxu0 }
  0xd6   :  { %744 = vmatmul.msk.f32.gmra.mxu0 %vm79_vm0, %v49_v49  ;;  %v360_v49 = vld [vmem:[#allocation2 + $0xb8] sm:$0xff] }
  0xd9   :  { %v1163_v50 = vpop.f32.mrf.mxu3 }
  0xdb   :  { %v1165_v51 = vpop.f32.mrf.mxu0 }
  0xde   :  { %745 = vmatmul.msk.f32.gmra.mxu0 %vm79_vm0, %v50_v52  ;;  %v362_v52 = vld [vmem:[#allocation2 + $0xc8] sm:$0xff] }
  0xe1   :  { %v1171_v53 = vpop.f32.mrf.mxu3 }
  0xe3   :  { %v253_v54 = vpop.f32.mrf.mxu0 }
  0xe6   :  { %746 = vmatmul.msk.f32.gmra.mxu0 %vm79_vm0, %v51_v55  ;;  %v364_v55 = vld [vmem:[#allocation2 + $0xd8] sm:$0xff] }
  0xe9   :  { %v1177_v56 = vpop.f32.mrf.mxu3 }
  0xeb   :  { %v256_v57 = vpop.f32.mrf.mxu0 }
  0xee   :  { %747 = vmatmul.msk.f32.gmra.mxu0 %vm79_vm0, %v52_v58 }
  0xf1   :  { %v1183_v59 = vpop.f32.mrf.mxu3 }
  0xf3   :  { %v259_v60 = vpop.f32.mrf.mxu0 }
  0xf9   :  { %v1185_v61 = vpop.f32.mrf.mxu3 }
  0xfb   :  { %v262_v62 = vpop.f32.mrf.mxu0 }
 0x101   :  { %v328_v63 = vpop.f32.mrf.mxu3 }
 0x103   :  { %v265_v0 = vpop.f32.mrf.mxu0 }
 0x109   :  { %v331_v1 = vpop.f32.mrf.mxu3 }
 0x10b   :  { %v268_v2 = vpop.f32.mrf.mxu0 }
 0x111   :  { %v334_v3 = vpop.f32.mrf.mxu3 }
 0x112   :  { %514 = vmatpush.msra.mxu2 %v334_v3 }
 0x113   :  { %v271_v4 = vpop.f32.mrf.mxu0 }
 0x114   :  { %515 = vmatpush.msra.mxu2 %v331_v1 }
 0x116   :  { %516 = vmatpush.msra.mxu2 %v328_v63 }
 0x118   :  { %517 = vmatpush.msra.mxu2 %v1185_v61 }
 0x11a   :  { %518 = vmatpush.msra.mxu2 %v1183_v59 }
 0x11b   :  { %v274_v5 = vpop.f32.mrf.mxu0 }
 0x11c   :  { %519 = vmatpush.msra.mxu2 %v1177_v56 }
 0x11e   :  { %520 = vmatpush.msra.mxu2 %v1171_v53 }
 0x120   :  { %521 = vmatpush.msra.mxu2 %v1163_v50 }
 0x122   :  { %522 = vmatpush.msra.mxu2 %v1155_v47 }
 0x123   :  { %v277_v6 = vpop.f32.mrf.mxu0 }
 0x124   :  { %523 = vmatpush.msra.mxu2 %v1147_v44 }
 0x12b   :  { %v280_v7 = vpop.f32.mrf.mxu0 }
 0x133   :  { %v283_v8 = vpop.f32.mrf.mxu0 }
 0x13b   :  { %v286_v9 = vpop.f32.mrf.mxu0 }
 0x13c   :  { %401 = vmatpush.msra.mxu1 %v286_v9  ;;  %774 = vmatpush.msrb.mxu3 %v286_v9  ;;  %v377_v9 = vld [vmem:[#allocation2 + $0x140] sm:$0xff] }
 0x13e   :  { %402 = vmatpush.msra.mxu1 %v283_v8  ;;  %775 = vmatpush.msrb.mxu3 %v283_v8  ;;  %v372_v8 = vld [vmem:[#allocation2 + $0x118] sm:$0xff] }
 0x140   :  { %403 = vmatpush.msra.mxu1 %v280_v7  ;;  %776 = vmatpush.msrb.mxu3 %v280_v7 }
 0x142   :  { %404 = vmatpush.msra.mxu1 %v277_v6  ;;  %777 = vmatpush.msrb.mxu3 %v277_v6 }
 0x143   :  { %v289_v10 = vpop.f32.mrf.mxu0 }
 0x144   :  { %405 = vmatpush.msra.mxu1 %v274_v5  ;;  %778 = vmatpush.msrb.mxu3 %v274_v5 }
 0x146   :  { %406 = vmatpush.msra.mxu1 %v271_v4  ;;  %779 = vmatpush.msrb.mxu3 %v271_v4  ;;  %v375_v4 = vld [vmem:[#allocation2 + $0x130] sm:$0xff] }
 0x148   :  { %407 = vmatpush.msra.mxu1 %v268_v2  ;;  %780 = vmatpush.msrb.mxu3 %v268_v2 }
 0x14a   :  { %408 = vmatpush.msra.mxu1 %v265_v0  ;;  %781 = vmatpush.msrb.mxu3 %v265_v0  ;;  %v373_v0 = vld [vmem:[#allocation2 + $0x120] sm:$0xff] }
 0x14b   :  { %v292_v11 = vpop.f32.mrf.mxu0 }
 0x14c   :  { %409 = vmatpush.msra.mxu1 %v262_v62  ;;  %782 = vmatpush.msrb.mxu3 %v262_v62 }
 0x14e   :  { %410 = vmatpush.msra.mxu1 %v259_v60  ;;  %783 = vmatpush.msrb.mxu3 %v259_v60  ;;  %v371_v60 = vld [vmem:[#allocation2 + $0x110] sm:$0xff] }
 0x150   :  { %411 = vmatpush.msra.mxu1 %v256_v57  ;;  %784 = vmatpush.msrb.mxu3 %v256_v57  ;;  %v396_v57 = vld [vmem:[#allocation2 + $0x1d8] sm:$0xff] }
 0x152   :  { %412 = vmatpush.msra.mxu1 %v253_v54  ;;  %785 = vmatpush.msrb.mxu3 %v253_v54 }
 0x153   :  { %v295_v12 = vpop.f32.mrf.mxu0 }
 0x154   :  { %413 = vmatpush.msra.mxu1 %v1165_v51  ;;  %786 = vmatpush.msrb.mxu3 %v1165_v51  ;;  %v367_v51 = vld [vmem:[#allocation2 + $0xf0] sm:$0xff] }
 0x156   :  { %414 = vmatpush.msra.mxu1 %v1157_v48  ;;  %787 = vmatpush.msrb.mxu3 %v1157_v48  ;;  %v365_v48 = vld [vmem:[#allocation2 + $0xe0] sm:$0xff] }
 0x158   :  { %415 = vmatpush.msra.mxu1 %v1149_v45  ;;  %788 = vmatpush.msrb.mxu3 %v1149_v45  ;;  %v363_v45 = vld [vmem:[#allocation2 + $0xd0] sm:$0xff] }
 0x15a   :  { %416 = vmatpush.msra.mxu1 %v1141_v42  ;;  %789 = vmatpush.msrb.mxu3 %v1141_v42  ;;  %v399_v42 = vld [vmem:[#allocation2 + $0x1f0] sm:$0xff] }
 0x15b   :  { %v298_v14 = vpop.f32.mrf.mxu0  ;;  %417 = vmatmul.f32.vlgmr.msra.gmra.mxu1 %v337_v13  ;;  %495 = vmatmul.f32.vlgmr.msrb.gmra.mxu3 %v389_v27  ;;  %v383_v27 = vld [vmem:[#allocation2 + $0x170] sm:$0xff] }
 0x15c   :  { %790 = vmatpush.msra.mxu3 %v334_v3  ;;  %v370_v3 = vld [vmem:[#allocation2 + $0x108] sm:$0xff] }
 0x15e   :  { %791 = vmatpush.msra.mxu3 %v331_v1  ;;  %v400_v1 = vld [vmem:[#allocation2 + $0x1f8] sm:$0xff] }
 0x160   :  { %792 = vmatpush.msra.mxu3 %v328_v63  ;;  %v368_v63 = vld [vmem:[#allocation2 + $0xf8] sm:$0xff] }
 0x162   :  { %793 = vmatpush.msra.mxu3 %v1185_v61  ;;  %v398_v61 = vld [vmem:[#allocation2 + $0x1e8] sm:$0xff] }
 0x163   :  { %v301_v16 = vpop.f32.mrf.mxu0  ;;  %420 = vmatmul.f32.gmra.mxu1 %v339_v15  ;;  %498 = vmatmul.f32.gmra.mxu3 %v391_v30  ;;  %v379_v15 = vld [vmem:[#allocation2 + $0x150] sm:$0xff] }
 0x164   :  { %794 = vmatpush.msra.mxu3 %v1183_v59  ;;  %v366_v59 = vld [vmem:[#allocation2 + $0xe8] sm:$0xff] }
 0x166   :  { %795 = vmatpush.msra.mxu3 %v1177_v56  ;;  %v369_v56 = vld [vmem:[#allocation2 + $0x100] sm:$0xff] }
 0x168   :  { %796 = vmatpush.msra.mxu3 %v1171_v53  ;;  %v394_v53 = vld [vmem:[#allocation2 + $0x1c8] sm:$0xff] }
 0x16a   :  { %797 = vmatpush.msra.mxu3 %v1163_v50  ;;  %v392_v50 = vld [vmem:[#allocation2 + $0x1b8] sm:$0xff] }
 0x16b   :  { %v304_v18 = vpop.f32.mrf.mxu0  ;;  %423 = vmatmul.f32.gmra.mxu1 %v341_v17  ;;  %501 = vmatmul.f32.gmra.mxu3 %v393_v33  ;;  %v380_v33 = vld [vmem:[#allocation2 + $0x158] sm:$0xff] }
 0x16c   :  { %798 = vmatpush.msra.mxu3 %v1155_v47  ;;  %524 = vmatpush.msra.mxu2 %v304_v18  ;;  %v390_v47 = vld [vmem:[#allocation2 + $0x1a8] sm:$0xff] }
 0x16e   :  { %799 = vmatpush.msra.mxu3 %v1147_v44  ;;  %525 = vmatpush.msra.mxu2 %v301_v16  ;;  %v356_v44 = vld [vmem:[#allocation2 + $0x98] sm:$0xff] }
 0x170   :  { %800 = vmatpush.msra.mxu3 %v304_v18  ;;  %526 = vmatpush.msra.mxu2 %v298_v14 }
 0x172   :  { %801 = vmatpush.msra.mxu3 %v301_v16  ;;  %527 = vmatpush.msra.mxu2 %v295_v12 }
 0x173   :  { %426 = vmatmul.f32.gmra.mxu1 %v343_v19  ;;  %504 = vmatmul.f32.gmra.mxu3 %v395_v36 }
 0x174   :  { %802 = vmatpush.msra.mxu3 %v298_v14  ;;  %528 = vmatpush.msra.mxu2 %v292_v11  ;;  %v374_v14 = vld [vmem:[#allocation2 + $0x128] sm:$0xff] }
 0x176   :  { %803 = vmatpush.msra.mxu3 %v295_v12  ;;  %529 = vmatpush.msra.mxu2 %v289_v10 }
 0x177   :  { %530 = vmatmul.f32.vlgmr.msra.gmra.mxu2 %v338_v20  ;;  %v376_v20 = vld [vmem:[#allocation2 + $0x138] sm:$0xff] }
 0x178   :  { %804 = vmatpush.msra.mxu3 %v292_v11 }
 0x17a   :  { %805 = vmatpush.msra.mxu3 %v289_v10 }
 0x17b   :  { %429 = vmatmul.f32.gmra.mxu1 %v345_v21  ;;  %507 = vmatmul.f32.gmra.mxu3 %v397_v39  ;;  %v381_v21 = vld [vmem:[#allocation2 + $0x160] sm:$0xff] }
 0x17f   :  { %533 = vmatmul.f32.gmra.mxu2 %v340_v22 }
 0x183   :  { %432 = vmatmul.f32.gmra.mxu1 %v347_v23  ;;  %510 = vmatmul.f32.gmra.mxu3 %v399_v42 }
 0x187   :  { %536 = vmatmul.f32.gmra.mxu2 %v342_v24 }
 0x18b   :  { %435 = vmatmul.f32.gmra.mxu1 %v349_v25  ;;  %608 = vmatmul.f32.vlgmr.msra.gmra.mxu3 %v390_v47  ;;  %v384_v47 = vld [vmem:[#allocation2 + $0x178] sm:$0xff] }
 0x18f   :  { %539 = vmatmul.f32.gmra.mxu2 %v344_v26  ;;  %v378_v26 = vld [vmem:[#allocation2 + $0x148] sm:$0xff] }
 0x193   :  { %438 = vmatmul.f32.gmra.mxu1 %v351_v28  ;;  %611 = vmatmul.f32.gmra.mxu3 %v392_v50 }
 0x197   :  { %542 = vmatmul.f32.gmra.mxu2 %v346_v29 }
 0x19b   :  { %441 = vmatmul.f32.gmra.mxu1 %v353_v31  ;;  %614 = vmatmul.f32.gmra.mxu3 %v394_v53 }
 0x19f   :  { %545 = vmatmul.f32.gmra.mxu2 %v348_v32 }
 0x1a3   :  { %444 = vmatmul.f32.gmra.mxu1 %v355_v34  ;;  %617 = vmatmul.f32.gmra.mxu3 %v396_v57  ;;  %v385_v34 = vld [vmem:[#allocation2 + $0x180] sm:$0xff] }
 0x1a7   :  { %548 = vmatmul.f32.gmra.mxu2 %v350_v35 }
 0x1ab   :  { %447 = vmatmul.f32.gmra.mxu1 %v357_v37  ;;  %620 = vmatmul.f32.gmra.mxu3 %v398_v61 }
 0x1af   :  { %551 = vmatmul.f32.gmra.mxu2 %v352_v38 }
 0x1b3   :  { %450 = vmatmul.f32.gmra.mxu1 %v359_v40  ;;  %623 = vmatmul.f32.gmra.mxu3 %v400_v1  ;;  %v382_v40 = vld [vmem:[#allocation2 + $0x168] sm:$0xff] }
 0x1b7   :  { %554 = vmatmul.f32.gmra.mxu2 %v354_v41  ;;  %v387_v41 = vld [vmem:[#allocation2 + $0x190] sm:$0xff] }
 0x1bb   :  { %453 = vmatmul.f32.gmra.mxu1 %v361_v43 }
 0x1bf   :  { %557 = vmatmul.f32.gmra.mxu2 %v356_v44 }
 0x1c3   :  { %456 = vmatmul.f32.gmra.mxu1 %v363_v45 }
 0x1c7   :  { %560 = vmatmul.f32.gmra.mxu2 %v358_v46 }
 0x1cb   :  { %459 = vmatmul.f32.gmra.mxu1 %v365_v48 }
 0x1cf   :  { %563 = vmatmul.f32.gmra.mxu2 %v360_v49 }
 0x1d3   :  { %462 = vmatmul.f32.gmra.mxu1 %v367_v51 }
 0x1d7   :  { %566 = vmatmul.f32.gmra.mxu2 %v362_v52  ;;  %v386_v52 = vld [vmem:[#allocation2 + $0x188] sm:$0xff] }
 0x1d8   :  { %v418_v54 = vpop.f32.mrf.mxu1 }
 0x1db   :  { %465 = vmatmul.f32.gmra.mxu1 %v369_v56 }
 0x1de   :  { %v496_v32 = vpop.f32.mrf.mxu3 }
 0x1df   :  { %569 = vmatmul.f32.gmra.mxu2 %v364_v55 }
 0x1e0   :  { %v421_v58 = vpop.f32.mrf.mxu1 }
 0x1e3   :  { %468 = vmatmul.f32.gmra.mxu1 %v371_v60 }
 0x1e6   :  { %v499_v39 = vpop.f32.mrf.mxu3 }
 0x1e7   :  { %572 = vmatmul.f32.gmra.mxu2 %v366_v59 }
 0x1e8   :  { %v424_v62 = vpop.f32.mrf.mxu1 }
 0x1eb   :  { %471 = vmatmul.f32.gmra.mxu1 %v373_v0 }
 0x1ee   :  { %v502_v46 = vpop.f32.mrf.mxu3 }
 0x1ef   :  { %575 = vmatmul.f32.gmra.mxu2 %v368_v63 }
 0x1f0   :  { %v427_v2 = vpop.f32.mrf.mxu1 }
 0x1f3   :  { %474 = vmatmul.f32.gmra.mxu1 %v375_v4 }
 0x1f6   :  { %v505_v51 = vpop.f32.mrf.mxu3 }
 0x1f7   :  { %578 = vmatmul.f32.gmra.mxu2 %v370_v3 }
 0x1f8   :  { %v430_v6 = vpop.f32.mrf.mxu1 }
 0x1fa   :  { %v531_v5 = vpop.f32.mrf.mxu2 }
 0x1fb   :  { %v532_v7 = vadd.f32 %v531_v5, %v418_v54  ;;  %477 = vmatmul.f32.gmra.mxu1 %v377_v9 }
 0x1fd   :  { %812 = vtanh.f32 %v532_v7 }
 0x1fe   :  { %v508_v57 = vpop.f32.mrf.mxu3 }
 0x1ff   :  { %581 = vmatmul.f32.gmra.mxu2 %v372_v8 }
 0x200   :  { %v433_v11 = vpop.f32.mrf.mxu1 }
 0x202   :  { %v534_v10 = vpop.f32.mrf.mxu2 }
 0x203   :  { %v813_v12 = vpop.eup %812  ;;  %v535_v13 = vadd.f32 %v534_v10, %v421_v58  ;;  %480 = vmatmul.f32.gmra.mxu1 %v379_v15  ;;  %v388_v58 = vld [vmem:[#allocation2 + $0x198] sm:$0xff] }
 0x204   :  { %659 = vst [vmem:[#allocation5] sm:$0xff] %v813_v12 }
 0x205   :  { %814 = vtanh.f32 %v535_v13 }
 0x206   :  { %v511_v63 = vpop.f32.mrf.mxu3 }
 0x207   :  { %584 = vmatmul.f32.gmra.mxu2 %v374_v14 }
 0x208   :  { %v436_v17 = vpop.f32.mrf.mxu1 }
 0x20a   :  { %v537_v16 = vpop.f32.mrf.mxu2 }
 0x20b   :  { %v815_v18 = vpop.eup %814  ;;  %v538_v19 = vadd.f32 %v537_v16, %v424_v62  ;;  %483 = vmatmul.f32.gmra.mxu1 %v381_v21 }
 0x20c   :  { %660 = vst [vmem:[#allocation5 + $0x8] sm:$0xff] %v815_v18 }
 0x20d   :  { %816 = vtanh.f32 %v538_v19 }
 0x20e   :  { %v609_v4 = vpop.f32.mrf.mxu3 }
 0x20f   :  { %587 = vmatmul.f32.gmra.mxu2 %v376_v20  ;;  %v610_v5 = vadd.f32 %v609_v4, %v496_v32 }
 0x210   :  { %v439_v23 = vpop.f32.mrf.mxu1 }
 0x212   :  { %v540_v22 = vpop.f32.mrf.mxu2 }
 0x213   :  { %v817_v24 = vpop.eup %816  ;;  %v541_v25 = vadd.f32 %v540_v22, %v427_v2  ;;  %486 = vmatmul.f32.gmra.mxu1 %v383_v27 }
 0x214   :  { %661 = vst [vmem:[#allocation5 + $0x10] sm:$0xff] %v817_v24 }
 0x215   :  { %818 = vtanh.f32 %v541_v25 }
 0x216   :  { %v612_v10 = vpop.f32.mrf.mxu3 }
 0x217   :  { %590 = vmatmul.f32.gmra.mxu2 %v378_v26  ;;  %v613_v12 = vadd.f32 %v612_v10, %v499_v39 }
 0x218   :  { %v442_v29 = vpop.f32.mrf.mxu1 }
 0x21a   :  { %v543_v28 = vpop.f32.mrf.mxu2 }
 0x21b   :  { %v819_v30 = vpop.eup %818  ;;  %v544_v31 = vadd.f32 %v543_v28, %v430_v6  ;;  %489 = vmatmul.f32.gmra.mxu1 %v385_v34 }
 0x21c   :  { %662 = vst [vmem:[#allocation5 + $0x18] sm:$0xff] %v819_v30 }
 0x21d   :  { %820 = vtanh.f32 %v544_v31 }
 0x21e   :  { %v615_v16 = vpop.f32.mrf.mxu3 }
 0x21f   :  { %593 = vmatmul.f32.gmra.mxu2 %v380_v33  ;;  %v616_v19 = vadd.f32 %v615_v16, %v502_v46 }
 0x220   :  { %v445_v36 = vpop.f32.mrf.mxu1 }
 0x222   :  { %v546_v35 = vpop.f32.mrf.mxu2 }
 0x223   :  { %v821_v37 = vpop.eup %820  ;;  %v547_v38 = vadd.f32 %v546_v35, %v433_v11  ;;  %492 = vmatmul.f32.gmra.mxu1 %v387_v41 }
 0x224   :  { %663 = vst [vmem:[#allocation5 + $0x20] sm:$0xff] %v821_v37 }
 0x225   :  { %822 = vtanh.f32 %v547_v38 }
 0x227   :  { %596 = vmatmul.f32.gmra.mxu2 %v382_v40 }
 0x228   :  { %v448_v43 = vpop.f32.mrf.mxu1 }
 0x22a   :  { %v549_v42 = vpop.f32.mrf.mxu2 }
 0x22b   :  { %v823_v44 = vpop.eup %822  ;;  %v550_v45 = vadd.f32 %v549_v42, %v436_v17 }
 0x22c   :  { %664 = vst [vmem:[#allocation5 + $0x28] sm:$0xff] %v823_v44 }
 0x22d   :  { %824 = vtanh.f32 %v550_v45 }
 0x22f   :  { %599 = vmatmul.f32.gmra.mxu2 %v384_v47 }
 0x230   :  { %v451_v53 = vpop.f32.mrf.mxu1 }
 0x232   :  { %v552_v48 = vpop.f32.mrf.mxu2 }
 0x233   :  { %v825_v49 = vpop.eup %824  ;;  %v553_v50 = vadd.f32 %v552_v48, %v439_v23  ;;  %v618_v23 = vpop.f32.mrf.mxu3 }
 0x234   :  { %665 = vst [vmem:[#allocation5 + $0x30] sm:$0xff] %v825_v49  ;;  %v619_v25 = vadd.f32 %v618_v23, %v505_v51 }
 0x235   :  { %826 = vtanh.f32 %v553_v50 }
 0x237   :  { %602 = vmatmul.f32.gmra.mxu2 %v386_v52 }
 0x238   :  { %v454_v59 = vpop.f32.mrf.mxu1 }
 0x23a   :  { %v555_v54 = vpop.f32.mrf.mxu2 }
 0x23b   :  { %v827_v55 = vpop.eup %826  ;;  %v556_v56 = vadd.f32 %v555_v54, %v442_v29  ;;  %v621_v30 = vpop.f32.mrf.mxu3 }
 0x23c   :  { %666 = vst [vmem:[#allocation5 + $0x38] sm:$0xff] %v827_v55  ;;  %v622_v32 = vadd.f32 %v621_v30, %v508_v57 }
 0x23d   :  { %828 = vtanh.f32 %v556_v56 }
 0x23f   :  { %605 = vmatmul.f32.gmra.mxu2 %v388_v58 }
 0x240   :  { %v457_v0 = vpop.f32.mrf.mxu1 }
 0x242   :  { %v558_v60 = vpop.f32.mrf.mxu2 }
 0x243   :  { %v829_v61 = vpop.eup %828  ;;  %v559_v62 = vadd.f32 %v558_v60, %v445_v36  ;;  %v624_v37 = vpop.f32.mrf.mxu3 }
 0x244   :  { %667 = vst [vmem:[#allocation5 + $0x40] sm:$0xff] %v829_v61  ;;  %v625_v39 = vadd.f32 %v624_v37, %v511_v63 }
 0x245   :  { %830 = vtanh.f32 %v559_v62 }
 0x248   :  { %v460_v7 = vpop.f32.mrf.mxu1 }
 0x24a   :  { %v561_v1 = vpop.f32.mrf.mxu2 }
 0x24b   :  { %v831_v2 = vpop.eup %830  ;;  %v562_v3 = vadd.f32 %v561_v1, %v448_v43 }
 0x24c   :  { %668 = vst [vmem:[#allocation5 + $0x48] sm:$0xff] %v831_v2 }
 0x24d   :  { %832 = vtanh.f32 %v562_v3 }
 0x24e   :  { %834 = vtanh.f32 %v610_v5 }
 0x250   :  { %v463_v18 = vpop.f32.mrf.mxu1 }
 0x252   :  { %v564_v6 = vpop.f32.mrf.mxu2 }
 0x253   :  { %v833_v8 = vpop.eup %832  ;;  %v565_v9 = vadd.f32 %v564_v6, %v451_v53 }
 0x254   :  { %v835_v11 = vpop.eup %834  ;;  %669 = vst [vmem:[#allocation5 + $0x50] sm:$0xff] %v833_v8 }
 0x255   :  { %836 = vtanh.f32 %v565_v9  ;;  %685 = vst [vmem:[#allocation5 + $0xd0] sm:$0xff] %v835_v11 }
 0x256   :  { %838 = vtanh.f32 %v613_v12 }
 0x258   :  { %v466_v26 = vpop.f32.mrf.mxu1 }
 0x25a   :  { %v567_v13 = vpop.f32.mrf.mxu2 }
 0x25b   :  { %v837_v14 = vpop.eup %836  ;;  %v568_v15 = vadd.f32 %v567_v13, %v454_v59 }
 0x25c   :  { %v839_v17 = vpop.eup %838  ;;  %670 = vst [vmem:[#allocation5 + $0x58] sm:$0xff] %v837_v14 }
 0x25d   :  { %840 = vtanh.f32 %v568_v15  ;;  %686 = vst [vmem:[#allocation5 + $0xd8] sm:$0xff] %v839_v17 }
 0x25e   :  { %842 = vtanh.f32 %v616_v19 }
 0x260   :  { %v469_v33 = vpop.f32.mrf.mxu1 }
 0x262   :  { %v570_v20 = vpop.f32.mrf.mxu2 }
 0x263   :  { %v841_v21 = vpop.eup %840  ;;  %v571_v22 = vadd.f32 %v570_v20, %v457_v0 }
 0x264   :  { %v843_v24 = vpop.eup %842  ;;  %671 = vst [vmem:[#allocation5 + $0x60] sm:$0xff] %v841_v21 }
 0x265   :  { %844 = vtanh.f32 %v571_v22  ;;  %687 = vst [vmem:[#allocation5 + $0xe0] sm:$0xff] %v843_v24 }
 0x266   :  { %846 = vtanh.f32 %v619_v25 }
 0x268   :  { %v472_v41 = vpop.f32.mrf.mxu1 }
 0x26a   :  { %v573_v27 = vpop.f32.mrf.mxu2 }
 0x26b   :  { %v845_v28 = vpop.eup %844  ;;  %v574_v29 = vadd.f32 %v573_v27, %v460_v7 }
 0x26c   :  { %v847_v31 = vpop.eup %846  ;;  %672 = vst [vmem:[#allocation5 + $0x68] sm:$0xff] %v845_v28 }
 0x26d   :  { %848 = vtanh.f32 %v574_v29  ;;  %688 = vst [vmem:[#allocation5 + $0xe8] sm:$0xff] %v847_v31 }
 0x26e   :  { %850 = vtanh.f32 %v622_v32 }
 0x270   :  { %v475_v48 = vpop.f32.mrf.mxu1 }
 0x272   :  { %v576_v34 = vpop.f32.mrf.mxu2 }
 0x273   :  { %v849_v35 = vpop.eup %848  ;;  %v577_v36 = vadd.f32 %v576_v34, %v463_v18 }
 0x274   :  { %v851_v38 = vpop.eup %850  ;;  %673 = vst [vmem:[#allocation5 + $0x70] sm:$0xff] %v849_v35 }
 0x275   :  { %852 = vtanh.f32 %v577_v36  ;;  %689 = vst [vmem:[#allocation5 + $0xf0] sm:$0xff] %v851_v38 }
 0x276   :  { %854 = vtanh.f32 %v625_v39 }
 0x278   :  { %v478_v52 = vpop.f32.mrf.mxu1 }
 0x27a   :  { %v579_v40 = vpop.f32.mrf.mxu2 }
 0x27b   :  { %v853_v42 = vpop.eup %852  ;;  %v580_v43 = vadd.f32 %v579_v40, %v466_v26 }
 0x27c   :  { %v855_v44 = vpop.eup %854  ;;  %674 = vst [vmem:[#allocation5 + $0x78] sm:$0xff] %v853_v42 }
 0x27d   :  { %856 = vtanh.f32 %v580_v43  ;;  %690 = vst [vmem:[#allocation5 + $0xf8] sm:$0xff] %v855_v44 }
 0x280   :  { %v481_v56 = vpop.f32.mrf.mxu1 }
 0x282   :  { %v582_v45 = vpop.f32.mrf.mxu2 }
 0x283   :  { %v857_v46 = vpop.eup %856  ;;  %v583_v47 = vadd.f32 %v582_v45, %v469_v33 }
 0x284   :  { %675 = vst [vmem:[#allocation5 + $0x80] sm:$0xff] %v857_v46 }
 0x285   :  { %858 = vtanh.f32 %v583_v47 }
 0x288   :  { %v484_v61 = vpop.f32.mrf.mxu1 }
 0x28a   :  { %v585_v49 = vpop.f32.mrf.mxu2 }
 0x28b   :  { %v859_v50 = vpop.eup %858  ;;  %v586_v51 = vadd.f32 %v585_v49, %v472_v41 }
 0x28c   :  { %676 = vst [vmem:[#allocation5 + $0x88] sm:$0xff] %v859_v50 }
 0x28d   :  { %860 = vtanh.f32 %v586_v51 }
 0x290   :  { %v487_v3 = vpop.f32.mrf.mxu1 }
 0x292   :  { %v588_v53 = vpop.f32.mrf.mxu2 }
 0x293   :  { %v861_v54 = vpop.eup %860  ;;  %v589_v55 = vadd.f32 %v588_v53, %v475_v48 }
 0x294   :  { %677 = vst [vmem:[#allocation5 + $0x90] sm:$0xff] %v861_v54 }
 0x295   :  { %862 = vtanh.f32 %v589_v55 }
 0x298   :  { %v490_v7 = vpop.f32.mrf.mxu1 }
 0x29a   :  { %v591_v57 = vpop.f32.mrf.mxu2 }
 0x29b   :  { %v863_v58 = vpop.eup %862  ;;  %v592_v59 = vadd.f32 %v591_v57, %v478_v52 }
 0x29c   :  { %678 = vst [vmem:[#allocation5 + $0x98] sm:$0xff] %v863_v58 }
 0x29d   :  { %864 = vtanh.f32 %v592_v59 }
 0x2a0   :  { %v493_v11 = vpop.f32.mrf.mxu1 }
 0x2a2   :  { %v594_v60 = vpop.f32.mrf.mxu2 }
 0x2a3   :  { %v865_v62 = vpop.eup %864  ;;  %v595_v63 = vadd.f32 %v594_v60, %v481_v56 }
 0x2a4   :  { %679 = vst [vmem:[#allocation5 + $0xa0] sm:$0xff] %v865_v62 }
 0x2a5   :  { %866 = vtanh.f32 %v595_v63 }
 0x2aa   :  { %v597_v0 = vpop.f32.mrf.mxu2 }
 0x2ab   :  { %v867_v1 = vpop.eup %866  ;;  %v598_v2 = vadd.f32 %v597_v0, %v484_v61 }
 0x2ac   :  { %680 = vst [vmem:[#allocation5 + $0xa8] sm:$0xff] %v867_v1 }
 0x2ad   :  { %868 = vtanh.f32 %v598_v2 }
 0x2b2   :  { %v600_v4 = vpop.f32.mrf.mxu2 }
 0x2b3   :  { %v869_v5 = vpop.eup %868  ;;  %v601_v6 = vadd.f32 %v600_v4, %v487_v3 }
 0x2b4   :  { %681 = vst [vmem:[#allocation5 + $0xb0] sm:$0xff] %v869_v5 }
 0x2b5   :  { %870 = vtanh.f32 %v601_v6 }
 0x2ba   :  { %v603_v8 = vpop.f32.mrf.mxu2 }
 0x2bb   :  { %v871_v9 = vpop.eup %870  ;;  %v604_v10 = vadd.f32 %v603_v8, %v490_v7 }
 0x2bc   :  { %682 = vst [vmem:[#allocation5 + $0xb8] sm:$0xff] %v871_v9 }
 0x2bd   :  { %872 = vtanh.f32 %v604_v10 }
 0x2c2   :  { %v606_v12 = vpop.f32.mrf.mxu2 }
 0x2c3   :  { %v873_v13 = vpop.eup %872  ;;  %v607_v14 = vadd.f32 %v606_v12, %v493_v11 }
 0x2c4   :  { %683 = vst [vmem:[#allocation5 + $0xc0] sm:$0xff] %v873_v13 }
 0x2c5   :  { %874 = vtanh.f32 %v607_v14 }
 0x2cb   :  { %v875_v15 = vpop.eup %874 }
 0x2cc   :  { %684 = vst [vmem:[#allocation5 + $0xc8] sm:$0xff] %v875_v15 }
 0x2cd   :  { %703 = dma.vmem_to_hbm [thread:$0]  %s696_s2, 4096, %s698_s30, [#allocation4], %s932_s4, %s932_s4, %s933_s5  }
 0x2ce   :  { %926 = dma.done.wait [#allocation4], 4096  }
 0x2cf   :  { %927 = vsyncadd [#allocation4], 4294963200 }
 0x2d0   :  { %708 = vsyncpa [#allocation3], 1 }
 0x2d1   :  { %709 = vsyncpa [#allocation4], 1 }

</bundles_post_ra>
